<compile_context>
chip_gen: v5e
topology: v5e:2x2
jax: 0.10.0
libtpu: 0.0.40
codegen_flags: <defaults>
</compile_context>

<pallas_src>
import functools
import numpy as np
import jax
import jax.numpy as jnp
from jax.experimental import pallas as pl
from jax.experimental.pallas import tpu as pltpu


def make_positional_encoding(d_model, max_len=5000, dtype=jnp.float32):
    """Sinusoidal table identical to the PyTorch __init__ (shape (max_len, d_model))."""
    position = np.arange(0, max_len, dtype=np.float32)[:, None]
    div_term = np.exp(np.arange(0, d_model, 2, dtype=np.float32)
                      * (-np.log(10000.0) / d_model))
    pe = np.zeros((max_len, d_model), dtype=np.float32)
    pe[:, 0::2] = np.sin(position * div_term)
    pe[:, 1::2] = np.cos(position * div_term)
    return jnp.asarray(pe, dtype=dtype)


# ---------------------------------------------------------------------------
# Kernels (operate on lane-dense 2D tiles of shape (ts, B*D))
# ---------------------------------------------------------------------------

def _pe_add_kernel(x_ref, pe_ref, o_ref):
    # Eval mode / p == 0: dropout is identity.
    o_ref[...] = x_ref[...] + pe_ref[...]


def _pe_add_dropout_kernel(x_ref, pe_ref, bits_ref, o_ref, *, threshold, scale):
    # Inverted dropout fused with the positional add:
    #   keep  <- bits < round((1-p) * 2^32)          (one uint32 compare)
    #   out   <- keep ? (x + pe) * (1/(1-p)) : 0
    y = x_ref[...] + pe_ref[...]
    keep = bits_ref[...] < jnp.uint32(threshold)
    o_ref[...] = jnp.where(keep, y * scale, jnp.zeros_like(y))


# ---------------------------------------------------------------------------
# Wrapper
# ---------------------------------------------------------------------------

def _choose_ts(S, row_elems, itemsize, with_bits, vmem_budget_bytes=12 << 20):
    """Pick a seq-tile so the double-buffered per-step working set
    (x + pe + out [+ uint32 bits]) stays under a conservative VMEM budget
    (12 MiB < v5e's 16 MiB default scoped limit; v6e/v7x have >= 32 MiB)."""
    bytes_per_row = row_elems * (3 * itemsize + (4 if with_bits else 0)) * 2
    ts = int(vmem_budget_bytes // max(bytes_per_row, 1))
    if ts >= S:
        return S
    return min(S, max(8, (ts // 8) * 8))


def positional_encoding(x, pe, *, p=0.1, training=False, key=None, ts=None):
    """x: (S, B, D); pe: (max_len, D). Returns dropout(x + pe[:S, None, :])."""
    S, B, D = x.shape
    dtype = x.dtype
    row = B * D

    # Lane-dense view: last block dim is B*D (full width) -> unmasked vector stores.
    x2 = x.reshape(S, row)
    # Cast once in the wrapper and tile pe across batch so the kernel add is a pure
    # elementwise op on matching (ts, B*D) tiles.
    pe_flat = jnp.tile(pe[:S].astype(dtype), (1, B))

    apply_dropout = bool(training) and float(p) > 0.0

    if ts is None:
        ts = _choose_ts(S, row, jnp.dtype(dtype).itemsize, apply_dropout)
    grid = (pl.cdiv(S, ts),)

    blk = pl.BlockSpec((ts, row), lambda i: (i, 0))

    if apply_dropout:
        if key is None:
            key = jax.random.PRNGKey(0)
        # TODO(synk): on real TPU hardware, pltpu.prng_random_bits inside the kernel
        # would avoid this extra HBM stream; it has no interpret/CPU lowering, so the
        # bits are drawn in plain JAX and streamed through the pipeline instead.
        bits = jax.random.bits(key, (S, row), dtype=jnp.uint32)
        threshold = min(int(round((1.0 - float(p)) * 2.0 ** 32)), 2 ** 32 - 1)
        scale = 1.0 / (1.0 - float(p))
        kernel = functools.partial(_pe_add_dropout_kernel,
                                   threshold=threshold, scale=scale)
        in_specs = [blk, blk, blk]
        args = (x2, pe_flat, bits)
    else:
        kernel = _pe_add_kernel
        in_specs = [blk, blk]
        args = (x2, pe_flat)

    out2 = pl.pallas_call(
        kernel,
        out_shape=jax.ShapeDtypeStruct((S, row), dtype),
        grid=grid,
        in_specs=in_specs,
        out_specs=pl.BlockSpec((ts, row), lambda i: (i, 0)),
        compiler_params=pltpu.CompilerParams(
            # No cross-step state (mask comes from an input stream), so the grid
            # axis is safe to shard across TensorCores on v7x.
            dimension_semantics=("parallel",)),
    )(*args)

    return out2.reshape(S, B, D)


# ---------------------------------------------------------------------------
# Self-test
# ---------------------------------------------------------------------------

if __name__ == "__main__":
    S, B, D = 8, 2, 32           # seq=8, batch=2, d_model=32
    max_len = 64
    p = 0.1

    key = jax.random.PRNGKey(0)
    kx, kd = jax.random.split(key)
    x = jax.random.normal(kx, (S, B, D), dtype=jnp.float32)
    pe = make_positional_encoding(D, max_len=max_len)

    ref = x + pe[:S][:, None, :]

    # Eval mode (dropout = identity) — exact reference check through the kernel.
    out_eval = jax.block_until_ready(
        positional_encoding(x, pe, p=p, training=False))
    np.testing.assert_allclose(np.asarray(out_eval), np.asarray(ref),
                               rtol=1e-6, atol=1e-6)

    # Train mode — fused dropout path. Dropped entries are exactly 0; kept entries
    # must equal the reference scaled by 1/(1-p).
    out_train = jax.block_until_ready(
        positional_encoding(x, pe, p=p, training=True, key=kd))
    assert out_train.shape == (S, B, D)
    out_np = np.asarray(out_train)
    ref_np = np.asarray(ref).astype(np.float64)
    kept = out_np != 0.0
    np.testing.assert_allclose(out_np[kept], (ref_np / (1.0 - p))[kept],
                               rtol=1e-5, atol=1e-5)

    print("KERNEL_OK")
</pallas_src>

<mosaic_0001>
module attributes {stable_mosaic.version = 11 : i64} {
  func.func @_pe_add_kernel(%arg0: i32, %arg1: memref<8x64xf32, #tpu.memory_space<vmem>>, %arg2: memref<8x64xf32, #tpu.memory_space<vmem>>, %arg3: memref<8x64xf32, #tpu.memory_space<vmem>>) attributes {dimension_semantics = [#tpu.dimension_semantics<parallel>], iteration_bounds = array<i64: 1>, scalar_prefetch = 0 : i64, scratch_operands = 0 : i64, tpu.core_type = #tpu.core_type<tc>, window_params = [{transform_indices = @transform_0, window_bounds = array<i64: 8, 64>}, {transform_indices = @transform_1, window_bounds = array<i64: 8, 64>}, {transform_indices = @transform_2, window_bounds = array<i64: 8, 64>}]} {
    %c0 = arith.constant 0 : index
    %c0_0 = arith.constant 0 : index
    %0 = vector.load %arg1[%c0, %c0_0] : memref<8x64xf32, #tpu.memory_space<vmem>>, vector<8x64xf32>
    %c0_1 = arith.constant 0 : index
    %c0_2 = arith.constant 0 : index
    %1 = vector.load %arg2[%c0_1, %c0_2] : memref<8x64xf32, #tpu.memory_space<vmem>>, vector<8x64xf32>
    %2 = arith.addf %0, %1 : vector<8x64xf32>
    %c0_3 = arith.constant 0 : index
    %c0_4 = arith.constant 0 : index
    %3 = vector.load %arg3[%c0_3, %c0_4] : memref<8x64xf32, #tpu.memory_space<vmem>>, vector<8x64xf32>
    tpu.vector_store %arg3[%c0_3, %c0_4], %2 {strides = array<i32>} : memref<8x64xf32, #tpu.memory_space<vmem>>, vector<8x64xf32>,
    return
  }
  func.func @transform_0(%arg0: i32) -> (i32, i32) {
    %c0_i32 = arith.constant 0 : i32
    %c0_i32_0 = arith.constant 0 : i32
    return %arg0, %c0_i32 : i32, i32
  }
  func.func @transform_1(%arg0: i32) -> (i32, i32) {
    %c0_i32 = arith.constant 0 : i32
    %c0_i32_0 = arith.constant 0 : i32
    return %arg0, %c0_i32 : i32, i32
  }
  func.func @transform_2(%arg0: i32) -> (i32, i32) {
    %c0_i32 = arith.constant 0 : i32
    %c0_i32_0 = arith.constant 0 : i32
    return %arg0, %c0_i32 : i32, i32
  }
}

</mosaic_0001>

<bundles_post_ra>
// kernel: tpu_custom_call.1
= control target key start
LH: loop header
LB: loop body
LE: loop exit
PB: predicated region body
PF: predicated region fallthrough
CT: control target
= control target key end

     0   :  { %7 = vsyncpa [#allocation3], 0  ;;  %s171_s0 = inlined_call_operand.hbm [shape: f32[8,64], index: 0, kind: input, shape index: {}]   ;;  %s172_s1 = inlined_call_operand.hbm [shape: f32[8,64], index: 1, kind: input, shape index: {}]   ;;  %s173_s2 = inlined_call_operand.hbm [shape: f32[8,64], index: 2, kind: output, shape index: {}]  }
   0x1   :  { %8 = vsyncpa [#allocation6], 0 }
   0x2   :  { %9 = vsyncpa [#allocation4], 0  ;;  %s15_s11 = sshll.u32 %s171_s0, 4  ;;  %s144_s12 = smov [#allocation2]   ;;  %s16_s11 = int_to_ptr.hbm [resolvable:$true] %s15_s11 }
   0x3   :  { %s17_s13 = sshll.u32 %s144_s12, 4  ;;  %s26_s16 = sshll.u32 %s172_s1, 4  ;;  %s18_s13 = int_to_ptr.vmem [resolvable:$true] %s17_s13  ;;  %s27_s16 = int_to_ptr.hbm [resolvable:$true] %s26_s16 }
   0x4   :  { %20 = dma.hbm_to_vmem [thread:$0]  %s16_s11, 128, %s18_s13, [#allocation3]  }
   0x5   :  { %s145_s17 = smov [#allocation5]  }
   0x6   :  { %s28_s18 = sshll.u32 %s145_s17, 4  ;;  %s29_s18 = int_to_ptr.vmem [resolvable:$true] %s28_s18 }
   0x7   :  { %31 = dma.hbm_to_vmem [thread:$0]  %s27_s16, 128, %s29_s18, [#allocation6]  }
   0x8   :  { %138 = dma.done.wait [#allocation3], 128  }
   0x9   :  { %139 = vsyncadd [#allocation3], 4294967168 }
   0xa   :  { %140 = dma.done.wait [#allocation6], 128  }
   0xb   :  { %141 = vsyncadd [#allocation6], 4294967168  ;;  %s146_s19 = smov [#allocation7]   ;;  %s52_s22 = sshll.u32 %s173_s2, 4  ;;  %v40_v0 = vld [vmem:[#allocation2] sm:$0xff]  ;;  %v41_v1 = vld [vmem:[#allocation5] sm:$0xff]  ;;  %s53_s22 = int_to_ptr.hbm [resolvable:$true] %s52_s22 }
   0xc   :  { %s50_s0 = sshll.u32 %s146_s19, 4  ;;  %vm43_vm0 = vcmask 523264   ;;  %v42_v2 = vadd.f32 %v41_v1, %v40_v0  ;;  %s51_s0 = int_to_ptr.vmem [resolvable:$true] %s50_s0 }
   0xe   :  { %44 = vst.msk [vmem:[#allocation7] sm:$0xff] %vm43_vm0, %v42_v2 }
   0xf   :  { %55 = dma.vmem_to_hbm [thread:$0]  %s51_s0, 128, %s53_s22, [#allocation4]  }
  0x10   :  { %142 = dma.done.wait [#allocation4], 128  }
  0x11   :  { %143 = vsyncadd [#allocation4], 4294967168 }
  0x12   :  { %60 = vsyncpa [#allocation3], 1 }
  0x13   :  { %61 = vsyncpa [#allocation6], 1 }
  0x14   :  { %62 = vsyncpa [#allocation4], 1 }

</bundles_post_ra>
